<compile_context>
chip_gen: v7x
topology: tpu7x:2x2x1
jax: 0.10.0
libtpu: 0.0.40
codegen_flags: <defaults>
</compile_context>

<pallas_src>
import jax
import jax.numpy as jnp
from jax.experimental import pallas as pl
from jax.experimental.pallas import tpu as pltpu


# ----------------------------------------------------------------------------
# Helpers
# ----------------------------------------------------------------------------
def _sigmoid_1push(x):
    # logistic(x) == 0.5 * tanh(0.5 * x) + 0.5 : exactly one EUP push per vreg.
    return 0.5 * jnp.tanh(0.5 * x) + 0.5


def _round_up(x, m):
    return ((x + m - 1) // m) * m


def _pick_tile(n, batch, max_tile_n=8192, lane=128):
    """Pick the point-axis tile (multiple of 128) and the padded point count.

    Big tiles amortize the ~0.35us/step grid overhead; with batch == 1 the point axis is
    split into >= 2 tiles so a 'parallel' grid axis can feed both v7x TensorCores.
    """
    n_pad = _round_up(max(n, 1), lane)
    tiles = max(1, -(-n_pad // max_tile_n))          # ceil division
    if batch == 1 and n_pad >= 2 * lane:
        tiles = max(tiles, 2)
    tn = _round_up(-(-n_pad // tiles), lane)
    n_pad = tn * tiles
    return tn, n_pad


def _default_compute_dtype():
    """bf16 z1 path on v6e / v7x (bf16 VALU/EUP/MXU); f32 on v5e and older."""
    try:
        kind = jax.devices()[0].device_kind.lower()
    except Exception:
        return jnp.float32
    if any(tag in kind for tag in ("v6", "v7", "7x", "trillium")):
        return jnp.bfloat16
    return jnp.float32


# ----------------------------------------------------------------------------
# Pallas kernel.  One (3, TN) tile of one batch per grid step ("M on lanes"):
#   z1 = sigmoid(W3^T @ p^T + c_b)        -- K=3 contraction unrolled on the VPU
#   z2 = sigmoid(W2^T @ z1 + b2^T)        -- 4E-deep contraction on the MXU (f32 acc)
# ----------------------------------------------------------------------------
def polynet_kernel(pt_ref, cb_ref, w3t_ref, w2t_ref, b2t_ref, o_ref):
    pt = pt_ref[...]                                   # (3, TN)  points, lane-dense
    w3t = w3t_ref[...]                                 # (4E, 3)  fused mapper+mlp[0] weight

    # K=3 contraction: three VPU broadcast multiply-adds (an MXU dot would be ~2% utilized).
    # Single straight chain, no intermediate forced to VMEM.  The (4E,1) lane-broadcast and
    # (1,TN) sublane-broadcast operands stay vreg-resident; no (4E,TN) temporaries needed.
    z1 = cb_ref[...]                                   # (4E, 1)  fused per-batch bias
    z1 = z1 + w3t[:, 0:1] * pt[0:1, :]                 # (4E,1)*(1,TN) -> (4E,TN)
    z1 = z1 + w3t[:, 1:2] * pt[1:2, :]
    z1 = z1 + w3t[:, 2:3] * pt[2:3, :]
    z1 = _sigmoid_1push(z1)                            # (4E, TN) in compute dtype

    z2 = jnp.dot(w2t_ref[...], z1,                     # (3, 4E) @ (4E, TN) -> (3, TN) f32
                 preferred_element_type=jnp.float32)
    z2 = z2 + b2t_ref[...]                             # (3, 1) f32 bias
    o_ref[...] = _sigmoid_1push(z2).astype(o_ref.dtype)


# ----------------------------------------------------------------------------
# Wrappers
# ----------------------------------------------------------------------------
def polynet_forward_channels_first(x_tokens, pt, params, *, compute_dtype=None,
                                   max_tile_n=8192):
    """Fast path: `pt` is (B, 3, N) ("M on lanes"); returns (B, 3, N).

    Keeping this layout end-to-end avoids the two strided HBM layout passes of the
    PyTorch (B, N, 3) layout and keeps every load/store lane-dense.
    """
    if compute_dtype is None:
        compute_dtype = _default_compute_dtype()

    B, _, N = pt.shape
    H = params["w1"].shape[1]                          # 4 * embed_dim

    # TODO(synk): the `ViT` encoder class is not defined in the provided source; tokens are
    # taken as already encoded and only the CLS token x[:, 0, :] is consumed, as in forward().
    cls = x_tokens[:, 0, :].astype(jnp.float32)        # (B, E)

    # TODO(synk): the `Decoder` class is not defined in the provided source; its
    # cross-attention is replaced by additive CLS conditioning, folded exactly (f32):
    #   (p @ Wm + bm + cls) @ W1 + b1 = p @ (Wm @ W1) + (cls @ W1 + bm @ W1 + b1)
    wm = params["wm"].astype(jnp.float32)
    w1 = params["w1"].astype(jnp.float32)
    w3 = wm @ w1                                                       # (3, 4E)
    cb = cls @ w1 + params["bm"].astype(jnp.float32) @ w1 + params["b1"]  # (B, 4E)

    # Operands in the kernel's "M on lanes" layout; z1-path operands in compute dtype.
    w3t = w3.T.astype(compute_dtype)                   # (4E, 3)
    cb3 = cb[:, :, None].astype(compute_dtype)         # (B, 4E, 1)
    w2t = params["w2"].T.astype(compute_dtype)         # (3, 4E)
    b2t = params["b2"].reshape(-1, 1).astype(jnp.float32)   # (3, 1), added in f32

    TN, n_pad = _pick_tile(N, B, max_tile_n)
    pt_c = pt.astype(compute_dtype)
    if n_pad != N:
        pt_c = jnp.pad(pt_c, ((0, 0), (0, 0), (0, n_pad - N)))

    grid = (B, n_pad // TN)

    out = pl.pallas_call(
        polynet_kernel,
        out_shape=jax.ShapeDtypeStruct((B, 3, n_pad), jnp.float32),
        grid=grid,
        in_specs=[
            pl.BlockSpec((None, 3, TN), lambda b, n: (b, 0, n)),   # points tile (lane-dense)
            pl.BlockSpec((None, H, 1), lambda b, n: (b, 0, 0)),    # fused per-batch bias
            pl.BlockSpec((H, 3), lambda b, n: (0, 0)),             # W3^T (VMEM-resident)
            pl.BlockSpec((3, H), lambda b, n: (0, 0)),             # W2^T (VMEM-resident)
            pl.BlockSpec((3, 1), lambda b, n: (0, 0)),             # b2^T (VMEM-resident)
        ],
        out_specs=pl.BlockSpec((None, 3, TN), lambda b, n: (b, 0, n)),
        compiler_params=pltpu.CompilerParams(
            dimension_semantics=("parallel", "parallel"),
            # Worst-case live VMEM ~6 MiB (z1 temp + double-buffered (3,TN) tiles); keep the
            # default scoped limit explicit so larger max_tile_n stays safe on all gens.
            vmem_limit_bytes=32 * 1024 * 1024,
        ),
    )(pt_c, cb3, w3t, w2t, b2t)

    if n_pad != N:
        out = out[:, :, :N]
    return out


def polynet_forward(x_tokens, p, params, **kwargs):
    """PyTorch-layout wrapper: p is (B, N, 3) -> (B, N, 3).

    The two swapaxes below are the only extra HBM passes; performance-sensitive callers
    should use polynet_forward_channels_first and keep the (B, 3, N) layout end-to-end.
    """
    out_t = polynet_forward_channels_first(
        x_tokens, jnp.swapaxes(p, 1, 2), params, **kwargs)
    return jnp.swapaxes(out_t, 1, 2)


# ----------------------------------------------------------------------------
# Pure-JAX reference of the (un-fused) forward for numerical validation.
# ----------------------------------------------------------------------------
def reference_forward(x_tokens, p, params):
    cls = x_tokens[:, 0, :]
    h = p @ params["wm"] + params["bm"]                # mapper
    h = h + cls[:, None, :]                            # decoder placeholder (additive CLS)
    z1 = jax.nn.sigmoid(h @ params["w1"] + params["b1"])
    z2 = jax.nn.sigmoid(z1 @ params["w2"] + params["b2"])
    return z2


# ----------------------------------------------------------------------------
# Deterministic parameter init (nn.Linear shapes; W stored for right-multiplication,
# biases as (1, fan_out) rows).
# ----------------------------------------------------------------------------
def init_params(key, embed_dim=16):
    def linear(k, fan_in, fan_out):
        kw, kb = jax.random.split(k)
        bound = 1.0 / jnp.sqrt(fan_in)
        w = jax.random.uniform(kw, (fan_in, fan_out), jnp.float32, -bound, bound)
        b = jax.random.uniform(kb, (1, fan_out), jnp.float32, -bound, bound)
        return w, b

    k1, k2, k3 = jax.random.split(key, 3)
    wm, bm = linear(k1, 3, embed_dim)                  # mapper
    w1, b1 = linear(k2, embed_dim, 4 * embed_dim)      # mlp[0]
    w2, b2 = linear(k3, 4 * embed_dim, 3)              # mlp[2]
    return {"wm": wm, "bm": bm, "w1": w1, "b1": b1, "w2": w2, "b2": b2}


if __name__ == "__main__":
    key = jax.random.PRNGKey(0)
    k_x, k_p, k_par = jax.random.split(key, 3)

    embed_dim = 16
    B, T, N = 2, 8, 8                                  # batch, encoder tokens, query points

    x_tokens = jax.random.normal(k_x, (B, T, embed_dim), jnp.float32)
    p = jax.random.normal(k_p, (B, N, 3), jnp.float32)
    params = init_params(k_par, embed_dim)

    compute_dtype = _default_compute_dtype()           # bf16 on v6e/v7x, f32 on v5e
    out = polynet_forward(x_tokens, p, params, compute_dtype=compute_dtype)
    out = jax.block_until_ready(out)

    assert out.shape == (B, N, 3), out.shape
    assert bool(jnp.all(jnp.isfinite(out)))
    # Final sigmoid -> values in [0, 1].
    assert bool(jnp.all((out >= 0.0) & (out <= 1.0)))

    # Validate the algebraically-fused kernel against the un-fused reference.  Fusion
    # changes f32 rounding order; the bf16 z1 path (v6e/v7x) needs a looser tolerance.
    ref = reference_forward(x_tokens, p, params)
    tol = 1e-4 if compute_dtype == jnp.float32 else 3e-2
    max_err = float(jnp.max(jnp.abs(out - ref)))
    assert max_err <= tol, max_err

    print("KERNEL_OK")
</pallas_src>

<mosaic_0001>
module attributes {stable_mosaic.version = 11 : i64} {
  func.func @polynet_kernel(%arg0: i32, %arg1: i32, %arg2: memref<1x3x128xf32, #tpu.memory_space<vmem>>, %arg3: memref<1x64x1xf32, #tpu.memory_space<vmem>>, %arg4: memref<64x3xf32, #tpu.memory_space<vmem>>, %arg5: memref<3x64xf32, #tpu.memory_space<vmem>>, %arg6: memref<3x1xf32, #tpu.memory_space<vmem>>, %arg7: memref<1x3x128xf32, #tpu.memory_space<vmem>>) attributes {dimension_semantics = [#tpu.dimension_semantics<parallel>, #tpu.dimension_semantics<parallel>], iteration_bounds = array<i64: 2, 1>, scalar_prefetch = 0 : i64, scratch_operands = 0 : i64, tpu.core_type = #tpu.core_type<tc>, window_params = [{transform_indices = @transform_0, window_bounds = array<i64: 1, 3, 128>}, {transform_indices = @transform_1, window_bounds = array<i64: 1, 64, 1>}, {pipeline_mode = #tpu.pipeline_mode<synchronous>, transform_indices = @transform_2, window_bounds = array<i64: 64, 3>}, {pipeline_mode = #tpu.pipeline_mode<synchronous>, transform_indices = @transform_3, window_bounds = array<i64: 3, 64>}, {pipeline_mode = #tpu.pipeline_mode<synchronous>, transform_indices = @transform_4, window_bounds = array<i64: 3, 1>}, {transform_indices = @transform_5, window_bounds = array<i64: 1, 3, 128>}]} {
    %c0 = arith.constant 0 : index
    %c0_0 = arith.constant 0 : index
    %c0_1 = arith.constant 0 : index
    %0 = vector.load %arg2[%c0, %c0_0, %c0_1] : memref<1x3x128xf32, #tpu.memory_space<vmem>>, vector<1x3x128xf32>
    %1 = vector.shape_cast %0 : vector<1x3x128xf32> to vector<3x128xf32>
    %c0_2 = arith.constant 0 : index
    %c0_3 = arith.constant 0 : index
    %2 = vector.load %arg4[%c0_2, %c0_3] : memref<64x3xf32, #tpu.memory_space<vmem>>, vector<64x3xf32>
    %c0_4 = arith.constant 0 : index
    %c0_5 = arith.constant 0 : index
    %c0_6 = arith.constant 0 : index
    %3 = vector.load %arg3[%c0_4, %c0_5, %c0_6] : memref<1x64x1xf32, #tpu.memory_space<vmem>>, vector<1x64x1xf32>
    %4 = vector.shape_cast %3 : vector<1x64x1xf32> to vector<64x1xf32>
    %5 = vector.extract_strided_slice %2 {offsets = [0, 0], sizes = [64, 1], strides = [1, 1]} : vector<64x3xf32> to vector<64x1xf32>
    %6 = vector.extract_strided_slice %1 {offsets = [0, 0], sizes = [1, 128], strides = [1, 1]} : vector<3x128xf32> to vector<1x128xf32>
    %7 = vector.broadcast %5 : vector<64x1xf32> to vector<64x128xf32>
    %8 = vector.broadcast %6 : vector<1x128xf32> to vector<64x128xf32>
    %9 = arith.mulf %7, %8 : vector<64x128xf32>
    %10 = vector.broadcast %4 : vector<64x1xf32> to vector<64x128xf32>
    %11 = arith.addf %10, %9 : vector<64x128xf32>
    %12 = vector.extract_strided_slice %2 {offsets = [0, 1], sizes = [64, 1], strides = [1, 1]} : vector<64x3xf32> to vector<64x1xf32>
    %13 = vector.extract_strided_slice %1 {offsets = [1, 0], sizes = [1, 128], strides = [1, 1]} : vector<3x128xf32> to vector<1x128xf32>
    %14 = vector.broadcast %12 : vector<64x1xf32> to vector<64x128xf32>
    %15 = vector.broadcast %13 : vector<1x128xf32> to vector<64x128xf32>
    %16 = arith.mulf %14, %15 : vector<64x128xf32>
    %17 = arith.addf %11, %16 : vector<64x128xf32>
    %18 = vector.extract_strided_slice %2 {offsets = [0, 2], sizes = [64, 1], strides = [1, 1]} : vector<64x3xf32> to vector<64x1xf32>
    %19 = vector.extract_strided_slice %1 {offsets = [2, 0], sizes = [1, 128], strides = [1, 1]} : vector<3x128xf32> to vector<1x128xf32>
    %20 = vector.broadcast %18 : vector<64x1xf32> to vector<64x128xf32>
    %21 = vector.broadcast %19 : vector<1x128xf32> to vector<64x128xf32>
    %22 = arith.mulf %20, %21 : vector<64x128xf32>
    %23 = arith.addf %17, %22 : vector<64x128xf32>
    %cst = arith.constant 5.000000e-01 : f32
    %24 = vector.broadcast %cst : f32 to vector<64x128xf32>
    %25 = arith.mulf %24, %23 : vector<64x128xf32>
    %26 = math.tanh %25 : vector<64x128xf32>
    %cst_7 = arith.constant 5.000000e-01 : f32
    %27 = vector.broadcast %cst_7 : f32 to vector<64x128xf32>
    %28 = arith.mulf %27, %26 : vector<64x128xf32>
    %cst_8 = arith.constant 5.000000e-01 : f32
    %29 = vector.broadcast %cst_8 : f32 to vector<64x128xf32>
    %30 = arith.addf %28, %29 : vector<64x128xf32>
    %c0_9 = arith.constant 0 : index
    %c0_10 = arith.constant 0 : index
    %31 = vector.load %arg5[%c0_9, %c0_10] : memref<3x64xf32, #tpu.memory_space<vmem>>, vector<3x64xf32>
    %cst_11 = arith.constant dense<0.000000e+00> : vector<3x128xf32>
    %32 = tpu.matmul %31, %30, %cst_11 {dimension_numbers = #tpu.dot_dimension_numbers<[1], [0], [0], [1], [0, 0, 1, 1], [], []>} : vector<3x64xf32>, vector<64x128xf32>, vector<3x128xf32> -> vector<3x128xf32>
    %c0_12 = arith.constant 0 : index
    %c0_13 = arith.constant 0 : index
    %33 = vector.load %arg6[%c0_12, %c0_13] : memref<3x1xf32, #tpu.memory_space<vmem>>, vector<3x1xf32>
    %34 = vector.broadcast %33 : vector<3x1xf32> to vector<3x128xf32>
    %35 = arith.addf %32, %34 : vector<3x128xf32>
    %cst_14 = arith.constant 5.000000e-01 : f32
    %36 = vector.broadcast %cst_14 : f32 to vector<3x128xf32>
    %37 = arith.mulf %36, %35 : vector<3x128xf32>
    %38 = math.tanh %37 : vector<3x128xf32>
    %cst_15 = arith.constant 5.000000e-01 : f32
    %39 = vector.broadcast %cst_15 : f32 to vector<3x128xf32>
    %40 = arith.mulf %39, %38 : vector<3x128xf32>
    %cst_16 = arith.constant 5.000000e-01 : f32
    %41 = vector.broadcast %cst_16 : f32 to vector<3x128xf32>
    %42 = arith.addf %40, %41 : vector<3x128xf32>
    %c0_17 = arith.constant 0 : index
    %c0_18 = arith.constant 0 : index
    %c0_19 = arith.constant 0 : index
    %43 = vector.load %arg7[%c0_17, %c0_18, %c0_19] : memref<1x3x128xf32, #tpu.memory_space<vmem>>, vector<1x3x128xf32>
    %44 = vector.shape_cast %43 : vector<1x3x128xf32> to vector<3x128xf32>
    %45 = vector.shape_cast %42 : vector<3x128xf32> to vector<1x3x128xf32>
    tpu.vector_store %arg7[%c0_17, %c0_18, %c0_19], %45 {strides = array<i32>} : memref<1x3x128xf32, #tpu.memory_space<vmem>>, vector<1x3x128xf32>,
    return
  }
  func.func @transform_0(%arg0: i32, %arg1: i32) -> (i32, i32, i32) {
    %c0_i32 = arith.constant 0 : i32
    %c0_i32_0 = arith.constant 0 : i32
    return %arg0, %c0_i32, %arg1 : i32, i32, i32
  }
  func.func @transform_1(%arg0: i32, %arg1: i32) -> (i32, i32, i32) {
    %c0_i32 = arith.constant 0 : i32
    %c0_i32_0 = arith.constant 0 : i32
    %c0_i32_1 = arith.constant 0 : i32
    return %arg0, %c0_i32, %c0_i32_0 : i32, i32, i32
  }
  func.func @transform_2(%arg0: i32, %arg1: i32) -> (i32, i32) {
    %c0_i32 = arith.constant 0 : i32
    %c0_i32_0 = arith.constant 0 : i32
    %c0_i32_1 = arith.constant 0 : i32
    return %c0_i32, %c0_i32_0 : i32, i32
  }
  func.func @transform_3(%arg0: i32, %arg1: i32) -> (i32, i32) {
    %c0_i32 = arith.constant 0 : i32
    %c0_i32_0 = arith.constant 0 : i32
    %c0_i32_1 = arith.constant 0 : i32
    return %c0_i32, %c0_i32_0 : i32, i32
  }
  func.func @transform_4(%arg0: i32, %arg1: i32) -> (i32, i32) {
    %c0_i32 = arith.constant 0 : i32
    %c0_i32_0 = arith.constant 0 : i32
    %c0_i32_1 = arith.constant 0 : i32
    return %c0_i32, %c0_i32_0 : i32, i32
  }
  func.func @transform_5(%arg0: i32, %arg1: i32) -> (i32, i32, i32) {
    %c0_i32 = arith.constant 0 : i32
    %c0_i32_0 = arith.constant 0 : i32
    return %arg0, %c0_i32, %arg1 : i32, i32, i32
  }
}

</mosaic_0001>

<bundles_post_ra>
// kernel: tpu_custom_call.1
= control target key start
LH: loop header
LB: loop body
LE: loop exit
PB: predicated region body
PF: predicated region fallthrough
CT: control target
= control target key end

     0   :  { %s877_s18 = smov 0   ;;  %s879_s19 = smov 0   ;;  %s1017_s0 = inlined_call_operand.vmem [shape: f32[2,3,128], index: 0, kind: input, shape index: {}]   ;;  %s1018_s1 = inlined_call_operand.vmem [shape: f32[2,64,1], index: 1, kind: input, shape index: {}]   ;;  %s1019_s2 = inlined_call_operand.vmem [shape: f32[64,3], index: 2, kind: input, shape index: {}]   ;;  %s1020_s3 = inlined_call_operand.vmem [shape: f32[3,64], index: 3, kind: input, shape index: {}]   ;;  %s1021_s4 = inlined_call_operand.vmem [shape: f32[3,1], index: 4, kind: input, shape index: {}]   ;;  %s1022_s5 = inlined_call_operand.vmem [shape: f32[2,3,128], index: 5, kind: output, shape index: {}]  }
   0x1   :  { %s881_s20 = smov 0  }
   0x2 LB: > { %s27_s21 = sadd.s32 1, %s835_s19  ;;  %p700_p0 = scmp.ge.s32.totalorder %s839_s20, 1  ;;  %s839_s20 = sphi %s881_s20, %s15_s20   ;;  %s835_s19 = sphi %s879_s19, %s1024_s19   ;;  %s831_s18 = sphi %s877_s18, %s1023_s18  }
   0x3   : > { %p29_p1 = scmp.ge.s32.totalorder %s27_s21, 2  ;;  %p215_p2 = scmp.lt.s32.totalorder %s839_s20, 3 }
   0x5   : > { %s1026_s21 = smov (%p29_p1, %s27_s21), 0  ;;  %p216_p3 = pnand %p700_p0, %p215_p2 }
   0x6   : > { %v272_v0 = vld [vmem:[%s1019_s2] sm:$0xff] (!%p216_p3)  ;;  %p252_p4 = scmp.lt.s32.totalorder (!%p216_p3), %s831_s18, 1  ;;  %v841_v1 = vmov (!%p216_p3), 0   ;;  %v273_v2 = vld [vmem:[%s1019_s2 + $0x8] sm:$0xff] (!%p216_p3)  ;;  %v275_v4 = vld [vmem:[%s1019_s2 + $0x18] sm:$0xff] (!%p216_p3)  ;;  %v842_v7 = vmov (!%p216_p3), 1   ;;  %v328_v26 = vlaneseq (!%p216_p3) }
   0x7   : > { %219 = sbr.rel (%p216_p3) target bundleno = 490 (0x1ea), region = 40  ;;  %779 = vset.pattern.permute.xlu0 (!%p216_p3), %v841_v1  ;;  %780 = vset.pattern.permute.xlu1 (!%p216_p3), %v841_v1  ;;  %v277_v8 = vld [vmem:[%s1019_s2 + $0x28] sm:$0xff] (!%p216_p3)  ;;  %v274_v9 = vld [vmem:[%s1019_s2 + $0x10] sm:$0xff] (!%p216_p3)  ;;  %v279_v11 = vld [vmem:[%s1019_s2 + $0x38] sm:$0xff] (!%p216_p3)  ;;  %v843_v12 = vmov (!%p216_p3), 2   ;;  %v844_v18 = vmov (!%p216_p3), 0.0|0.0  }
   0x8   : > { %290 = vperm.xlu0 (!%p216_p3), %779, %v272_v0   ;;  %v276_v15 = vld [vmem:[%s1019_s2 + $0x20] sm:$0xff] (!%p216_p3)  ;;  %v278_v16 = vld [vmem:[%s1019_s2 + $0x30] sm:$0xff] (!%p216_p3)  ;;  %737 = vmatprep.subr.bf16.mxu0 (!%p216_p3), %v844_v18  ;;  %vm845_vm0 = vmmov (!%p216_p3), 0   ;;  %v846_v20 = vmov (!%p216_p3), 0.0   ;;  %v329_v29 = vshrl.u32 (!%p216_p3), %v328_v26, 7  ;;  %vm531_vm1 = vcmask (!%p216_p3), 523264  }
   0x9   : > { %734 = vmatprep.mubr.msk.f32.mxu0 (!%p216_p3), %vm845_vm0, %v846_v20  ;;  %v525_v21 = vld [vmem:[%s1021_s4] sm:$0x7] (!%p216_p3) }
   0xa   : > { %v330_v32 = vsub.s32 (!%p216_p3), 0, %v329_v29  ;;  %v422_v33 = vsub.s32 (!%p216_p3), 1, %v329_v29  ;;  %v474_v39 = vsub.s32 (!%p216_p3), 2, %v329_v29 }
   0xc   : > { %295 = vperm.xlu0 (!%p216_p3), %779, %v273_v2  }
   0xe   : > { %s1028_s18 = smov (!%p252_p4, %s831_s18), 1 }
   0xf   : > { %s708_s26 = sshll.u32 %s1028_s18, 6  ;;  %s701_s23 = sshll.u32 %s1028_s18, 2 }
  0x10   : > { %s909_s29 = scalar_lea.vmem %s1018_s1, %s708_s26  ;;  %305 = vperm.xlu0 %779, %v275_v4   ;;  %s258_s26 = scalar_lea.vmem %s1017_s0, %s701_s23 }
  0x11   : > { %v280_v3 = vld [vmem:[%s909_s29] sm:$0xff]  ;;  %v281_v5 = vld [vmem:[%s909_s29 + $0x8] sm:$0xff]  ;;  %v282_v6 = vld [vmem:[%s909_s29 + $0x10] sm:$0xff]  ;;  %s270_s6 = scalar_lea.vmem %s1022_s5, %s701_s23 }
  0x12   : > { %342 = vperm.xlu1 %780, %v280_v3   ;;  %v284_v10 = vld [vmem:[%s909_s29 + $0x20] sm:$0xff]  ;;  %v286_v13 = vld [vmem:[%s909_s29 + $0x30] sm:$0xff]  ;;  %v283_v14 = vld [vmem:[%s909_s29 + $0x18] sm:$0xff] }
  0x13   : > { %v285_v17 = vld [vmem:[%s909_s29 + $0x28] sm:$0xff]  ;;  %v287_v19 = vld [vmem:[%s909_s29 + $0x38] sm:$0xff]  ;;  %v271_v34 = vld [vmem:[%s258_s26] sm:$0x7] }
  0x14   : > { %352 = vperm.xlu0 %779, %v282_v6   ;;  %v959_v37 = vrot.slane %v271_v34, %v330_v32  ;;  %v961_v38 = vrot.slane %v271_v34, %v422_v33  ;;  %v967_v44 = vrot.slane %v271_v34, %v474_v39 }
  0x16   : > { %347 = vperm.xlu1 %780, %v281_v5  }
  0x18   : > { %315 = vperm.xlu0 %779, %v277_v8  }
  0x1a   : > { %781 = vset.pattern.permute.xlu1 %v842_v7 }
  0x1b   : > { %393 = vperm.xlu1 %781, %v273_v2  }
  0x1c   : > { %362 = vperm.xlu0 %779, %v284_v10  }
  0x1f   : > { %782 = vset.pattern.permute.xlu1 %v841_v1 }
  0x20   : > { %300 = vperm.xlu1 %782, %v274_v9   ;;  %325 = vperm.xlu0 %779, %v279_v11  }
  0x24   : > { %783 = vset.pattern.permute.xlu1 %v843_v12  ;;  %372 = vperm.xlu0 %779, %v286_v13  }
  0x25   : > { %441 = vperm.xlu1 %783, %v272_v0  }
  0x28   : > { %792 = vset.pattern.permute.xlu0 %v842_v7 }
  0x29   : > { %445 = vperm.xlu1 %783, %v273_v2   ;;  %389 = vperm.xlu0 %792, %v272_v0  }
  0x2d   : > { %784 = vset.pattern.permute.xlu1 %v841_v1  ;;  %397 = vperm.xlu0 %792, %v274_v9  }
  0x2e   : > { %357 = vperm.xlu1 %784, %v283_v14  }
  0x31   : > { %405 = vperm.xlu0 %792, %v276_v15  }
  0x32   : > { %785 = vset.pattern.permute.xlu1 %v842_v7 }
  0x33   : > { %401 = vperm.xlu1 %785, %v275_v4  }
  0x35   : > { %413 = vperm.xlu0 %792, %v278_v16  }
  0x37   : > { %786 = vset.pattern.permute.xlu1 %v841_v1 }
  0x38   : > { %310 = vperm.xlu1 %786, %v276_v15  }
  0x39   : > { %796 = vset.pattern.permute.xlu0 %v843_v12 }
  0x3a   : > { %469 = vperm.xlu0 %796, %v279_v11  }
  0x3c   : > { %787 = vset.pattern.permute.xlu1 %v843_v12 }
  0x3d   : > { %449 = vperm.xlu1 %787, %v274_v9  }
  0x3e   : > { %798 = vset.pattern.permute.xlu0 %v841_v1 }
  0x41   : > { %453 = vperm.xlu1 %787, %v275_v4  }
  0x45   : > { %788 = vset.pattern.permute.xlu1 %v841_v1 }
  0x46   : > { %367 = vperm.xlu1 %788, %v285_v17  }
  0x4a   : > { %789 = vset.pattern.permute.xlu1 %v842_v7 }
  0x4b   : > { %409 = vperm.xlu1 %789, %v277_v8  }
  0x4f   : > { %790 = vset.pattern.permute.xlu1 %v841_v1 }
  0x50   : > { %320 = vperm.xlu1 %790, %v278_v16  }
  0x54   : > { %791 = vset.pattern.permute.xlu1 %v843_v12 }
  0x55   : > { %457 = vperm.xlu1 %791, %v276_v15  }
  0x59   : > { %461 = vperm.xlu1 %791, %v277_v8  }
  0x5d   : > { %793 = vset.pattern.permute.xlu1 %v841_v1 }
  0x5e   : > { %377 = vperm.xlu1 %793, %v287_v19  }
  0x62   : > { %794 = vset.pattern.permute.xlu1 %v842_v7 }
  0x63   : > { %417 = vperm.xlu1 %794, %v279_v11  }
  0x67   : > { %795 = vset.pattern.permute.xlu1 %v843_v12 }
  0x68   : > { %465 = vperm.xlu1 %795, %v278_v16  }
  0x6c   : > { %797 = vset.pattern.permute.xlu1 %v841_v1 }
  0x6d   : > { %528 = vperm.xlu1 %797, %v525_v21  }
  0x87   : > { %v291_v22 = vpop.permute.xlu0 %290 }
  0x88   : > { %v332_v50 = vmul.f32 %v959_v37, %v291_v22 }
  0x8b   : > { %v296_v23 = vpop.permute.xlu0 %295 }
  0x8c   : > { %v333_v40 = vmul.f32 %v959_v37, %v296_v23 }
  0x8f   : > { %v306_v25 = vpop.permute.xlu0 %305 }
  0x90   : > { %v335_v2 = vmul.f32 %v959_v37, %v306_v25 }
  0x91   : > { %v343_v24 = vpop.permute.xlu1 %342 }
  0x92   : > { %v380_v54 = vadd.f32 %v343_v24, %v332_v50 }
  0x93   : > { %v353_v28 = vpop.permute.xlu0 %352 }
  0x95   : > { %v348_v27 = vpop.permute.xlu1 %347 }
  0x96   : > { %v381_v45 = vadd.f32 %v348_v27, %v333_v40 }
  0x97   : > { %v955_v31 = vpop.permute.xlu0 %315 }
  0x9a   : > { %v394_v30 = vpop.permute.xlu1 %393 }
  0x9b   : > { %v957_v36 = vpop.permute.xlu0 %362  ;;  %v425_v43 = vmul.f32 %v961_v38, %v394_v30 }
  0x9d   : > { %v433_v48 = vadd.f32 %v425_v43, %v381_v45  ;;  %v337_v43 = vmul.f32 %v959_v37, %v955_v31 }
  0x9f   : > { %v301_v35 = vpop.permute.xlu1 %300  ;;  %v964_v42 = vpop.permute.xlu0 %325 }
  0xa0   : > { %v334_v63 = vmul.f32 %v959_v37, %v301_v35 }
  0xa2   : > { %v382_v3 = vadd.f32 %v353_v28, %v334_v63 }
  0xa3   : > { %v969_v47 = vpop.permute.xlu0 %372 }
  0xa4   : > { %v442_v41 = vpop.permute.xlu1 %441 }
  0xa5   : > { %v476_v57 = vmul.f32 %v967_v44, %v442_v41 }
  0xa8   : > { %v446_v46 = vpop.permute.xlu1 %445  ;;  %v390_v52 = vpop.permute.xlu0 %389 }
  0xa9   : > { %v477_v49 = vmul.f32 %v967_v44, %v446_v46  ;;  %v424_v56 = vmul.f32 %v961_v38, %v390_v52 }
  0xab   : > { %v485_v51 = vadd.f32 %v477_v49, %v433_v48  ;;  %v432_v58 = vadd.f32 %v424_v56, %v380_v54 }
  0xac   : > { %v398_v62 = vpop.permute.xlu0 %397 }
  0xad   : > { %v358_v53 = vpop.permute.xlu1 %357  ;;  %v493_v55 = vmul.f32 0.5, %v485_v51  ;;  %v484_v59 = vadd.f32 %v476_v57, %v432_v58  ;;  %v426_v1 = vmul.f32 %v961_v38, %v398_v62 }
  0xae   : > { %v383_v9 = vadd.f32 %v358_v53, %v335_v2 }
  0xaf   : > { %799 = vtanh.f32 %v493_v55  ;;  %v492_v61 = vmul.f32 0.5, %v484_v59  ;;  %v434_v6 = vadd.f32 %v426_v1, %v382_v3 }
  0xb0   : > { %v406_v28 = vpop.permute.xlu0 %405 }
  0xb1   : > { %801 = vtanh.f32 %v492_v61  ;;  %v428_v34 = vmul.f32 %v961_v38, %v406_v28 }
  0xb2   : > { %v402_v60 = vpop.permute.xlu1 %401 }
  0xb3   : > { %v427_v7 = vmul.f32 %v961_v38, %v402_v60  ;;  %v339_v60 = vmul.f32 %v959_v37, %v964_v42 }
  0xb4   : > { %v414_v56 = vpop.permute.xlu0 %413 }
  0xb5   : > { %v435_v14 = vadd.f32 %v427_v7, %v383_v9  ;;  %v430_v2 = vmul.f32 %v961_v38, %v414_v56 }
  0xb7   : > { %v311_v0 = vpop.permute.xlu1 %310 }
  0xb8   : > { %v336_v27 = vmul.f32 %v959_v37, %v311_v0 }
  0xb9   : > { %v800_v4 = vpop.eup %799  ;;  %v470_v59 = vpop.permute.xlu0 %469 }
  0xba   : > { %v509_v11 = vmul.f32 0.5, %v800_v4  ;;  %v384_v33 = vadd.f32 %v957_v36, %v336_v27  ;;  %v483_v0 = vmul.f32 %v967_v44, %v470_v59 }
  0xbb   : > { %v802_v12 = vpop.eup %801 }
  0xbc   : > { %v450_v5 = vpop.permute.xlu1 %449  ;;  %v508_v17 = vmul.f32 0.5, %v802_v12  ;;  %v517_v21 = vadd.f32 0.5, %v509_v11  ;;  %v436_v45 = vadd.f32 %v428_v34, %v384_v33 }
  0xbd   : > { %v478_v8 = vmul.f32 %v967_v44, %v450_v5 }
  0xbe   : > { %v516_v20 = vadd.f32 0.5, %v508_v17 }
  0xbf   : > { %v486_v10 = vadd.f32 %v478_v8, %v434_v6 }
  0xc0   : > { %v454_v13 = vpop.permute.xlu1 %453  ;;  %v738_v24 = vpack.c.bf16 %v517_v21, %v516_v20  ;;  %v524_v21 = vld [vmem:[%s1020_s3] sm:$0x7] }
  0xc1   : > { %v494_v15 = vmul.f32 0.5, %v486_v10  ;;  %v479_v16 = vmul.f32 %v967_v44, %v454_v13 }
  0xc2   : > { %739 = vmatpush3.bf16.msra.mxu0 %v738_v24 }
  0xc3   : > { %803 = vtanh.f32 %v494_v15  ;;  %v487_v19 = vadd.f32 %v479_v16, %v435_v14  ;;  %740 = vmatprep.subr.bf16.mxu0 %v844_v18 }
  0xc5   : > { %v495_v22 = vmul.f32 0.5, %v487_v19  ;;  %v368_v23 = vpop.permute.xlu1 %367 }
  0xc6   : > { %v385_v50 = vadd.f32 %v368_v23, %v337_v43 }
  0xc7   : > { %805 = vtanh.f32 %v495_v22 }
  0xca   : > { %v410_v25 = vpop.permute.xlu1 %409 }
  0xcb   : > { %v429_v46 = vmul.f32 %v961_v38, %v410_v25 }
  0xcd   : > { %v804_v26 = vpop.eup %803  ;;  %v437_v36 = vadd.f32 %v429_v46, %v385_v50 }
  0xce   : > { %v510_v30 = vmul.f32 0.5, %v804_v26 }
  0xcf   : > { %v321_v29 = vpop.permute.xlu1 %320 }
  0xd0   : > { %v518_v40 = vadd.f32 0.5, %v510_v30  ;;  %v338_v58 = vmul.f32 %v959_v37, %v321_v29 }
  0xd1   : > { %v806_v32 = vpop.eup %805 }
  0xd2   : > { %v511_v35 = vmul.f32 0.5, %v806_v32  ;;  %v386_v1 = vadd.f32 %v969_v47, %v338_v58 }
  0xd4   : > { %v458_v39 = vpop.permute.xlu1 %457  ;;  %v519_v41 = vadd.f32 0.5, %v511_v35  ;;  %v438_v7 = vadd.f32 %v430_v2, %v386_v1 }
  0xd5   : > { %v480_v48 = vmul.f32 %v967_v44, %v458_v39 }
  0xd6   : > { %v741_v49 = vpack.c.bf16 %v519_v41, %v518_v40 }
  0xd7   : > { %v488_v51 = vadd.f32 %v480_v48, %v436_v45 }
  0xd8   : > { %v462_v52 = vpop.permute.xlu1 %461  ;;  %742 = vmatpush3.bf16.msra.mxu0 %v741_v49 }
  0xd9   : > { %v496_v53 = vmul.f32 0.5, %v488_v51  ;;  %v481_v54 = vmul.f32 %v967_v44, %v462_v52  ;;  %743 = vmatprep.subr.bf16.mxu0 %v844_v18 }
  0xdb   : > { %807 = vtanh.f32 %v496_v53  ;;  %v489_v55 = vadd.f32 %v481_v54, %v437_v36 }
  0xdd   : > { %v497_v31 = vmul.f32 0.5, %v489_v55  ;;  %v378_v57 = vpop.permute.xlu1 %377 }
  0xde   : > { %v387_v62 = vadd.f32 %v378_v57, %v339_v60 }
  0xdf   : > { %809 = vtanh.f32 %v497_v31 }
  0xe2   : > { %v418_v61 = vpop.permute.xlu1 %417 }
  0xe3   : > { %v431_v63 = vmul.f32 %v961_v38, %v418_v61 }
  0xe5   : > { %v808_v3 = vpop.eup %807  ;;  %v439_v4 = vadd.f32 %v431_v63, %v387_v62 }
  0xe6   : > { %v512_v8 = vmul.f32 0.5, %v808_v3 }
  0xe7   : > { %v491_v5 = vadd.f32 %v483_v0, %v439_v4  ;;  %v466_v6 = vpop.permute.xlu1 %465 }
  0xe8   : > { %v482_v9 = vmul.f32 %v967_v44, %v466_v6  ;;  %v520_v13 = vadd.f32 0.5, %v512_v8 }
  0xe9   : > { %v810_v10 = vpop.eup %809  ;;  %v499_v37 = vmul.f32 0.5, %v491_v5 }
  0xea   : > { %v513_v42 = vmul.f32 0.5, %v810_v10  ;;  %v490_v11 = vadd.f32 %v482_v9, %v438_v7 }
  0xeb   : > { %811 = vtanh.f32 %v499_v37 }
  0xec   : > { %v498_v12 = vmul.f32 0.5, %v490_v11  ;;  %v521_v14 = vadd.f32 0.5, %v513_v42  ;;  %v529_v22 = vpop.permute.xlu1 %528 }
  0xee   : > { %813 = vtanh.f32 %v498_v12  ;;  %v744_v47 = vpack.c.bf16 %v521_v14, %v520_v13 }
  0xf0   : > { %745 = vmatpush3.bf16.msra.mxu0 %v744_v47 }
  0xf1   : > { %746 = vmatprep.subr.bf16.mxu0 %v844_v18 }
  0xf5   : > { %v812_v38 = vpop.eup %811 }
  0xf6   : > { %v515_v15 = vmul.f32 0.5, %v812_v38 }
  0xf8   : > { %v814_v16 = vpop.eup %813  ;;  %v523_v44 = vadd.f32 0.5, %v515_v15 }
  0xf9   : > { %v514_v17 = vmul.f32 0.5, %v814_v16 }
  0xfb   : > { %v522_v19 = vadd.f32 0.5, %v514_v17 }
  0xfd   : > { %v747_v20 = vpack.c.bf16 %v523_v44, %v522_v19 }
  0xff   : > { %748 = vmatpush3.bf16.msra.mxu0 %v747_v20 }
 0x102   : > { %735 = vmatmul.mubr.msk.f32.vlgmr.msra.gmra.mrb[0].mxu0 %vm531_vm1, %v524_v21 }
 0x1d5   : > { %v601_v23 = vpop.f32.mrb[0].mxu0 }
 0x1d6   : > { %v602_v24 = vadd.f32 %v601_v23, %v529_v22  ;;  %v736_v25 = vpop.f32.mrb[1].mxu0 }
 0x1d8   : > { %v605_v18 = vmul.f32 0.5, %v602_v24 }
 0x1da   : > { %815 = vtanh.f32 %v605_v18 }
 0x1e4   : > { %v816_v26 = vpop.eup %815 }
 0x1e5   : > { %v607_v27 = vmul.f32 0.5, %v816_v26 }
 0x1e7   : > { %v608_v28 = vadd.f32 0.5, %v607_v27 }
 0x1e9   : > { %609 = vst [vmem:[%s270_s6] sm:$0x7] %v608_v28 }
 0x1ea PF: > { %s15_s20 = sadd.s32 1, %s839_s20   ;;  %s1023_s18 = smov %s835_s19 }
 0x1eb   : > { %p12_p5 = scmp.ge.s32.totalorder %s15_s20, 4   ;;  %s1024_s19 = smov %s1026_s21 }
 0x1ed   :  { %14 = sbr.rel (!%p12_p5) target bundleno = 2 (0x2), region = 73 }

</bundles_post_ra>
